<compile_context>
chip_gen: v7x
topology: tpu7x:2x2x1
jax: 0.10.0
libtpu: 0.0.40
codegen_flags: <defaults>
</compile_context>

<pallas_src>
import jax
import jax.numpy as jnp
from jax import lax
from jax.experimental import pallas as pl
from jax.experimental.pallas import tpu as pltpu


def _round_up(x, m):
    return ((x + m - 1) // m) * m


def _auto_t_chunk(T, Bp, Hp):
    """Pick a T-chunk so 2x(xproj f32 + Y bf16) chunks fit a conservative VMEM
    budget (v7x scoped default is 32 MiB; leave plenty of headroom)."""
    step_bytes = Bp * Hp * (4 + 2)            # one time step: xproj f32 + Y bf16
    budget = 8 * 1024 * 1024                  # per double-buffered stream
    tc = max(1, budget // (2 * step_bytes))
    return int(min(T, tc, 64))                # cap unroll length


def rnn_chunk_kernel(xproj_ref, whh_ref, h0_ref, y_ref, h_scratch):
    """One grid step processes a chunk of Tc time steps.

    xproj_ref: (Tc, Bp, Hp) f32   precomputed onehot(x_t) @ W_ih.T + b_ih + b_hh
    whh_ref:   (Hp, Hp)    bf16   W_hh.T (resident across the grid)
    h0_ref:    (Bp, Hp)    f32    initial hidden state (resident)
    y_ref:     (Tc, Bp, Hp) bf16  hidden state of every step in this chunk
    h_scratch: (Bp, Hp)    f32    VMEM carry across grid steps
    """
    @pl.when(pl.program_id(0) == 0)
    def _():
        h_scratch[...] = h0_ref[...]

    w = whh_ref[...]                          # bf16, stays in vregs/VMEM
    Tc = xproj_ref.shape[0]

    def step(t, h):
        # Only the true serial dependency lives here: h @ W_hh.T (bf16 MXU,
        # f32 accum) + precomputed input projection, then tanh (EUP).
        h = jnp.tanh(xproj_ref[t]
                     + jnp.dot(h.astype(jnp.bfloat16), w,
                               preferred_element_type=jnp.float32))
        y_ref[t] = h.astype(y_ref.dtype)
        return h

    h_scratch[...] = lax.fori_loop(0, Tc, step, h_scratch[...], unroll=True)


def rnn_model_forward(inputs, state, params, positions_number, t_chunk=None):
    """inputs: (batch, seq_len) int32 token indices in [0, positions_number).
       state:  (1, batch, hidden) float32 (num_layers=1, unidirectional).
       Returns (output, new_state); output shape (seq_len*batch, positions_number)."""
    B, T = inputs.shape
    V = positions_number
    H = params["W_hh"].shape[0]

    # Hardware tiles: batch -> sublane multiple of 8, hidden/vocab -> lane 128.
    Bp = max(_round_up(B, 8), 8)
    Hp = max(_round_up(H, 128), 128)
    Vp = max(_round_up(V, 128), 128)

    if t_chunk is None:
        t_chunk = _auto_t_chunk(T, Bp, Hp)
    Tc = max(1, min(int(t_chunk), T))
    Tp = _round_up(T, Tc)
    n_chunks = Tp // Tc

    # ---- wrapper-side precompute -------------------------------------------
    # one-hot(x_t) @ W_ih.T  ==  row gather from W_ih.T; fold both biases in.
    w_ih_t = params["W_ih"].T                                   # (V, H)
    bias = (params["b_ih"] + params["b_hh"]).reshape(1, 1, H)
    tokens_tb = inputs.T                                        # (T, B) time-major
    xproj = jnp.take(w_ih_t, tokens_tb, axis=0) + bias          # (T, B, H) f32
    xproj = jnp.pad(xproj, ((0, Tp - T), (0, Bp - B), (0, Hp - H)))

    whh_t = jnp.pad(params["W_hh"].T,
                    ((0, Hp - H), (0, Hp - H))).astype(jnp.bfloat16)   # (Hp, Hp)
    h0 = jnp.pad(state[0].astype(jnp.float32),
                 ((0, Bp - B), (0, Hp - H)))                            # (Bp, Hp)

    # ---- serial recurrence: T-chunked grid, W_hh/h resident, Y streamed -----
    y = pl.pallas_call(
        rnn_chunk_kernel,
        out_shape=jax.ShapeDtypeStruct((Tp, Bp, Hp), jnp.bfloat16),
        grid_spec=pltpu.PrefetchScalarGridSpec(
            num_scalar_prefetch=0,
            grid=(n_chunks,),
            in_specs=[
                pl.BlockSpec((Tc, Bp, Hp), lambda c: (c, 0, 0)),   # xproj chunk
                pl.BlockSpec((Hp, Hp), lambda c: (0, 0)),          # W_hh.T resident
                pl.BlockSpec((Bp, Hp), lambda c: (0, 0)),          # h0 resident
            ],
            out_specs=pl.BlockSpec((Tc, Bp, Hp), lambda c: (c, 0, 0)),
            scratch_shapes=[pltpu.VMEM((Bp, Hp), jnp.float32)],    # h carry
        ),
        compiler_params=pltpu.CompilerParams(
            dimension_semantics=("arbitrary",)),                   # serial carry
    )(xproj, whh_t, h0)

    # ---- dense head: one lane-dense padded matmul outside the recurrence ----
    wd = jnp.pad(params["W_dense"].T,
                 ((0, Hp - H), (0, Vp - V))).astype(jnp.bfloat16)  # (Hp, Vp)
    bd = jnp.pad(params["b_dense"], (0, Vp - V))                   # (Vp,)
    out_p = jnp.dot(y.reshape(Tp * Bp, Hp), wd,
                    preferred_element_type=jnp.float32) + bd       # (Tp*Bp, Vp)
    out_p = out_p.reshape(Tp, Bp, Vp)
    output = out_p[:T, :B, :V].reshape(T * B, V)                   # Y.view(-1,H)@Wd

    new_state = y[T - 1, :B, :H].astype(jnp.float32)[None]         # (1, B, H)
    return output, new_state


def _reference_forward(inputs, state, params, positions_number):
    """Pure-JAX f32 reference (mirrors nn.RNN(tanh) + nn.Linear)."""
    B, T = inputs.shape
    V = positions_number
    x = jax.nn.one_hot(inputs.T, V, dtype=jnp.float32)             # (T, B, V)
    h = state[0]
    ys = []
    for t in range(T):
        h = jnp.tanh(x[t] @ params["W_ih"].T + params["b_ih"]
                     + h @ params["W_hh"].T + params["b_hh"])
        ys.append(h)
    Y = jnp.stack(ys)                                              # (T, B, H)
    out = Y.reshape(-1, Y.shape[-1]) @ params["W_dense"].T + params["b_dense"]
    return out, h[None]


def init_params(key, positions_number, hidden_size):
    """Deterministic init matching PyTorch default U(-1/sqrt(H), 1/sqrt(H))."""
    V, H = positions_number, hidden_size
    ks = jax.random.split(key, 6)
    s = 1.0 / jnp.sqrt(H)
    return {
        "W_ih": jax.random.uniform(ks[0], (H, V), jnp.float32, -s, s),
        "W_hh": jax.random.uniform(ks[1], (H, H), jnp.float32, -s, s),
        "b_ih": jax.random.uniform(ks[2], (H,), jnp.float32, -s, s),
        "b_hh": jax.random.uniform(ks[3], (H,), jnp.float32, -s, s),
        "W_dense": jax.random.uniform(ks[4], (V, H), jnp.float32, -s, s),
        "b_dense": jax.random.uniform(ks[5], (V,), jnp.float32, -s, s),
    }


if __name__ == "__main__":
    # Small shapes consistent with the module: positions_number(vocab)=16,
    # hidden=32, batch=4, seq=8.  t_chunk=4 -> 2 grid steps (exercises the
    # chunked pipeline and the VMEM-carried hidden state).
    positions_number = 16
    hidden_size = 32
    batch, seq_len = 4, 8

    key = jax.random.PRNGKey(0)
    k_par, k_inp, k_state = jax.random.split(key, 3)

    params = init_params(k_par, positions_number, hidden_size)
    inputs = jax.random.randint(k_inp, (batch, seq_len), 0, positions_number,
                                dtype=jnp.int32)
    state = jax.random.normal(k_state, (1, batch, hidden_size), jnp.float32)

    out, new_state = rnn_model_forward(inputs, state, params, positions_number,
                                       t_chunk=4)
    out = jax.block_until_ready(out)
    new_state = jax.block_until_ready(new_state)

    # Sanity check against the pure-JAX f32 reference.  Tolerance relaxed
    # because the recurrence matmul, Y storage and the head run in bf16.
    ref_out, ref_state = _reference_forward(inputs, state, params, positions_number)
    assert out.shape == (seq_len * batch, positions_number)
    assert new_state.shape == (1, batch, hidden_size)
    assert jnp.allclose(out, ref_out, atol=5e-2, rtol=5e-2)
    assert jnp.allclose(new_state, ref_state, atol=5e-2, rtol=5e-2)

    print("KERNEL_OK")
</pallas_src>

<mosaic_0001>
module attributes {stable_mosaic.version = 11 : i64} {
  func.func @rnn_chunk_kernel(%arg0: i32, %arg1: memref<4x8x128xf32, #tpu.memory_space<vmem>>, %arg2: memref<128x128xbf16, #tpu.memory_space<vmem>>, %arg3: memref<8x128xf32, #tpu.memory_space<vmem>>, %arg4: memref<4x8x128xbf16, #tpu.memory_space<vmem>>, %arg5: memref<8x128xf32, #tpu.memory_space<vmem>>) attributes {dimension_semantics = [#tpu.dimension_semantics<arbitrary>], iteration_bounds = array<i64: 2>, scalar_prefetch = 0 : i64, scratch_operands = 1 : i64, tpu.core_type = #tpu.core_type<tc>, window_params = [{transform_indices = @transform_0, window_bounds = array<i64: 4, 8, 128>}, {pipeline_mode = #tpu.pipeline_mode<synchronous>, transform_indices = @transform_1, window_bounds = array<i64: 128, 128>}, {pipeline_mode = #tpu.pipeline_mode<synchronous>, transform_indices = @transform_2, window_bounds = array<i64: 8, 128>}, {transform_indices = @transform_3, window_bounds = array<i64: 4, 8, 128>}]} {
    %c0_i32 = arith.constant 0 : i32
    %0 = arith.cmpi eq, %arg0, %c0_i32 : i32
    %1 = arith.extui %0 : i1 to i32
    %c0_i32_0 = arith.constant 0 : i32
    %2 = arith.cmpi ne, %1, %c0_i32_0 : i32
    scf.if %2 {
      %c0_26 = arith.constant 0 : index
      %c0_27 = arith.constant 0 : index
      %54 = vector.load %arg3[%c0_26, %c0_27] : memref<8x128xf32, #tpu.memory_space<vmem>>, vector<8x128xf32>
      %c0_28 = arith.constant 0 : index
      %c0_29 = arith.constant 0 : index
      %55 = vector.load %arg5[%c0_28, %c0_29] : memref<8x128xf32, #tpu.memory_space<vmem>>, vector<8x128xf32>
      tpu.vector_store %arg5[%c0_28, %c0_29], %54 {strides = array<i32>} : memref<8x128xf32, #tpu.memory_space<vmem>>, vector<8x128xf32>,
    } else {
    }
    %c0 = arith.constant 0 : index
    %c0_1 = arith.constant 0 : index
    %3 = vector.load %arg2[%c0, %c0_1] : memref<128x128xbf16, #tpu.memory_space<vmem>>, vector<128x128xbf16>
    %c0_2 = arith.constant 0 : index
    %c0_3 = arith.constant 0 : index
    %4 = vector.load %arg5[%c0_2, %c0_3] : memref<8x128xf32, #tpu.memory_space<vmem>>, vector<8x128xf32>
    %c0_i32_4 = arith.constant 0 : i32
    %5 = arith.index_cast %c0_i32_4 : i32 to index
    %c0_5 = arith.constant 0 : index
    %c0_6 = arith.constant 0 : index
    %6 = vector.load %arg1[%5, %c0_5, %c0_6] : memref<4x8x128xf32, #tpu.memory_space<vmem>>, vector<1x8x128xf32>
    %7 = vector.shape_cast %6 : vector<1x8x128xf32> to vector<8x128xf32>
    %8 = arith.truncf %4 : vector<8x128xf32> to vector<8x128xbf16>
    %cst = arith.constant dense<0.000000e+00> : vector<8x128xf32>
    %9 = tpu.matmul %8, %3, %cst {dimension_numbers = #tpu.dot_dimension_numbers<[1], [0], [0], [1], [0, 0, 1, 1], [], []>} : vector<8x128xbf16>, vector<128x128xbf16>, vector<8x128xf32> -> vector<8x128xf32>
    %10 = arith.addf %7, %9 : vector<8x128xf32>
    %11 = math.tanh %10 : vector<8x128xf32>
    %12 = arith.truncf %11 : vector<8x128xf32> to vector<8x128xbf16>
    %13 = arith.index_cast %c0_i32_4 : i32 to index
    %c0_7 = arith.constant 0 : index
    %c0_8 = arith.constant 0 : index
    %14 = vector.load %arg4[%13, %c0_7, %c0_8] : memref<4x8x128xbf16, #tpu.memory_space<vmem>>, vector<1x8x128xbf16>
    %15 = vector.shape_cast %14 : vector<1x8x128xbf16> to vector<8x128xbf16>
    %16 = vector.shape_cast %12 : vector<8x128xbf16> to vector<1x8x128xbf16>
    tpu.vector_store %arg4[%13, %c0_7, %c0_8], %16 {strides = array<i32>} : memref<4x8x128xbf16, #tpu.memory_space<vmem>>, vector<1x8x128xbf16>,
    %c1_i32 = arith.constant 1 : i32
    %17 = arith.index_cast %c1_i32 : i32 to index
    %c0_9 = arith.constant 0 : index
    %c0_10 = arith.constant 0 : index
    %18 = vector.load %arg1[%17, %c0_9, %c0_10] : memref<4x8x128xf32, #tpu.memory_space<vmem>>, vector<1x8x128xf32>
    %19 = vector.shape_cast %18 : vector<1x8x128xf32> to vector<8x128xf32>
    %20 = arith.truncf %11 : vector<8x128xf32> to vector<8x128xbf16>
    %cst_11 = arith.constant dense<0.000000e+00> : vector<8x128xf32>
    %21 = tpu.matmul %20, %3, %cst_11 {dimension_numbers = #tpu.dot_dimension_numbers<[1], [0], [0], [1], [0, 0, 1, 1], [], []>} : vector<8x128xbf16>, vector<128x128xbf16>, vector<8x128xf32> -> vector<8x128xf32>
    %22 = arith.addf %19, %21 : vector<8x128xf32>
    %23 = math.tanh %22 : vector<8x128xf32>
    %24 = arith.truncf %23 : vector<8x128xf32> to vector<8x128xbf16>
    %25 = arith.index_cast %c1_i32 : i32 to index
    %c0_12 = arith.constant 0 : index
    %c0_13 = arith.constant 0 : index
    %26 = vector.load %arg4[%25, %c0_12, %c0_13] : memref<4x8x128xbf16, #tpu.memory_space<vmem>>, vector<1x8x128xbf16>
    %27 = vector.shape_cast %26 : vector<1x8x128xbf16> to vector<8x128xbf16>
    %28 = vector.shape_cast %24 : vector<8x128xbf16> to vector<1x8x128xbf16>
    tpu.vector_store %arg4[%25, %c0_12, %c0_13], %28 {strides = array<i32>} : memref<4x8x128xbf16, #tpu.memory_space<vmem>>, vector<1x8x128xbf16>,
    %c2_i32 = arith.constant 2 : i32
    %29 = arith.index_cast %c2_i32 : i32 to index
    %c0_14 = arith.constant 0 : index
    %c0_15 = arith.constant 0 : index
    %30 = vector.load %arg1[%29, %c0_14, %c0_15] : memref<4x8x128xf32, #tpu.memory_space<vmem>>, vector<1x8x128xf32>
    %31 = vector.shape_cast %30 : vector<1x8x128xf32> to vector<8x128xf32>
    %32 = arith.truncf %23 : vector<8x128xf32> to vector<8x128xbf16>
    %cst_16 = arith.constant dense<0.000000e+00> : vector<8x128xf32>
    %33 = tpu.matmul %32, %3, %cst_16 {dimension_numbers = #tpu.dot_dimension_numbers<[1], [0], [0], [1], [0, 0, 1, 1], [], []>} : vector<8x128xbf16>, vector<128x128xbf16>, vector<8x128xf32> -> vector<8x128xf32>
    %34 = arith.addf %31, %33 : vector<8x128xf32>
    %35 = math.tanh %34 : vector<8x128xf32>
    %36 = arith.truncf %35 : vector<8x128xf32> to vector<8x128xbf16>
    %37 = arith.index_cast %c2_i32 : i32 to index
    %c0_17 = arith.constant 0 : index
    %c0_18 = arith.constant 0 : index
    %38 = vector.load %arg4[%37, %c0_17, %c0_18] : memref<4x8x128xbf16, #tpu.memory_space<vmem>>, vector<1x8x128xbf16>
    %39 = vector.shape_cast %38 : vector<1x8x128xbf16> to vector<8x128xbf16>
    %40 = vector.shape_cast %36 : vector<8x128xbf16> to vector<1x8x128xbf16>
    tpu.vector_store %arg4[%37, %c0_17, %c0_18], %40 {strides = array<i32>} : memref<4x8x128xbf16, #tpu.memory_space<vmem>>, vector<1x8x128xbf16>,
    %c3_i32 = arith.constant 3 : i32
    %41 = arith.index_cast %c3_i32 : i32 to index
    %c0_19 = arith.constant 0 : index
    %c0_20 = arith.constant 0 : index
    %42 = vector.load %arg1[%41, %c0_19, %c0_20] : memref<4x8x128xf32, #tpu.memory_space<vmem>>, vector<1x8x128xf32>
    %43 = vector.shape_cast %42 : vector<1x8x128xf32> to vector<8x128xf32>
    %44 = arith.truncf %35 : vector<8x128xf32> to vector<8x128xbf16>
    %cst_21 = arith.constant dense<0.000000e+00> : vector<8x128xf32>
    %45 = tpu.matmul %44, %3, %cst_21 {dimension_numbers = #tpu.dot_dimension_numbers<[1], [0], [0], [1], [0, 0, 1, 1], [], []>} : vector<8x128xbf16>, vector<128x128xbf16>, vector<8x128xf32> -> vector<8x128xf32>
    %46 = arith.addf %43, %45 : vector<8x128xf32>
    %47 = math.tanh %46 : vector<8x128xf32>
    %48 = arith.truncf %47 : vector<8x128xf32> to vector<8x128xbf16>
    %49 = arith.index_cast %c3_i32 : i32 to index
    %c0_22 = arith.constant 0 : index
    %c0_23 = arith.constant 0 : index
    %50 = vector.load %arg4[%49, %c0_22, %c0_23] : memref<4x8x128xbf16, #tpu.memory_space<vmem>>, vector<1x8x128xbf16>
    %51 = vector.shape_cast %50 : vector<1x8x128xbf16> to vector<8x128xbf16>
    %52 = vector.shape_cast %48 : vector<8x128xbf16> to vector<1x8x128xbf16>
    tpu.vector_store %arg4[%49, %c0_22, %c0_23], %52 {strides = array<i32>} : memref<4x8x128xbf16, #tpu.memory_space<vmem>>, vector<1x8x128xbf16>,
    %c4_i32 = arith.constant 4 : i32
    %c0_24 = arith.constant 0 : index
    %c0_25 = arith.constant 0 : index
    %53 = vector.load %arg5[%c0_24, %c0_25] : memref<8x128xf32, #tpu.memory_space<vmem>>, vector<8x128xf32>
    tpu.vector_store %arg5[%c0_24, %c0_25], %47 {strides = array<i32>} : memref<8x128xf32, #tpu.memory_space<vmem>>, vector<8x128xf32>,
    return
  }
  func.func @transform_0(%arg0: i32) -> (i32, i32, i32) {
    %c0_i32 = arith.constant 0 : i32
    %c0_i32_0 = arith.constant 0 : i32
    %c0_i32_1 = arith.constant 0 : i32
    return %arg0, %c0_i32, %c0_i32_0 : i32, i32, i32
  }
  func.func @transform_1(%arg0: i32) -> (i32, i32) {
    %c0_i32 = arith.constant 0 : i32
    %c0_i32_0 = arith.constant 0 : i32
    %c0_i32_1 = arith.constant 0 : i32
    return %c0_i32, %c0_i32_0 : i32, i32
  }
  func.func @transform_2(%arg0: i32) -> (i32, i32) {
    %c0_i32 = arith.constant 0 : i32
    %c0_i32_0 = arith.constant 0 : i32
    %c0_i32_1 = arith.constant 0 : i32
    return %c0_i32, %c0_i32_0 : i32, i32
  }
  func.func @transform_3(%arg0: i32) -> (i32, i32, i32) {
    %c0_i32 = arith.constant 0 : i32
    %c0_i32_0 = arith.constant 0 : i32
    %c0_i32_1 = arith.constant 0 : i32
    return %arg0, %c0_i32, %c0_i32_0 : i32, i32, i32
  }
}

</mosaic_0001>

<bundles_post_ra>
// kernel: tpu_custom_call.1
= control target key start
LH: loop header
LB: loop body
LE: loop exit
PB: predicated region body
PF: predicated region fallthrough
CT: control target
= control target key end

     0   :  { %8 = vsyncpa [#allocation4], 0  ;;  %s1331_s0 = inlined_call_operand.hbm [shape: f32[8,8,128], index: 0, kind: input, shape index: {}]   ;;  %s1332_s1 = inlined_call_operand.hbm [shape: bf16[128,128], index: 1, kind: input, shape index: {}]   ;;  %s1333_s2 = inlined_call_operand.hbm [shape: f32[8,128], index: 2, kind: input, shape index: {}]   ;;  %s1334_s3 = inlined_call_operand.hbm [shape: bf16[8,8,128], index: 3, kind: output, shape index: {}]  }
   0x1   :  { %10 = vsyncpa [#allocation4 + $0x1], 0 }
   0x2   :  { %11 = vsyncpa [#allocation7], 0 }
   0x3   :  { %12 = vsyncpa [#allocation5], 0 }
   0x4   :  { %14 = vsyncpa [#allocation5 + $0x1], 0  ;;  %s1016_s12 = smov 0   ;;  %s1018_s13 = smov 0  }
   0x5   :  { %s1020_s14 = smov 0   ;;  %s1022_s15 = smov 0  }
   0x6 LB: > { %s1037_s16 = sadd.s32 4294967295, %s982_s15   ;;  %s584_s17 = sadd.s32 4294967294, %s982_s15   ;;  %s982_s15 = sphi %s1022_s15, %s1355_s15   ;;  %s978_s14 = sphi %s1020_s14, %s1354_s14   ;;  %s974_s13 = sphi %s1018_s13, %s1353_s13   ;;  %s970_s12 = sphi %s1016_s12, %s1352_s12  }
   0x7   : > { %p40_p0 = scmp.ne.s32.totalorder %s974_s13, %s970_s12  ;;  %p1335_p1 = scmp.eq.s32.totalorder %s1037_s16, 0 }
   0x8   : > { %p112_p3 = scmp.eq.s32.totalorder %s584_s17, 1  ;;  %p585_p5 = scmp.ge.s32.totalorder %s982_s15, 1 }
   0x9   : > { %p1046_p4 = por %p1335_p1, %p40_p0  ;;  %p119_p7 = scmp.lt.s32.totalorder %s982_s15, 3 }
   0xa   : > { %p1051_p6 = por %p112_p3, %p40_p0  ;;  %s984_s21 = smov [#allocation6]  }
   0xb   : > { %s1338_s18 = scalar_select %p1046_p4, 1, 0 }
   0xc   : > { %s1339_s19 = scalar_select %p1051_p6, 1, 0 }
   0xd   : > { %p1057_p9 = pnand %p585_p5, %p119_p7  ;;  %s131_s22 = sshll.u32 %s984_s21, 4  ;;  %s1061_s22 = int_to_ptr.vmem [resolvable:$true] %s131_s22 }
   0xe   : > { %s985_s24 = smov [#allocation8]   ;;  %s826_s28 = scalar_lea.hbm %s1332_s1, 1024 }
   0xf   : > { %p747_p10 = pneg %p1057_p9  ;;  %s145_s25 = sshll.u32 %s985_s24, 4  ;;  %s1072_s25 = int_to_ptr.vmem [resolvable:$true] %s145_s25 }
  0x10   : > { %p827_p13 = scmp.ne.s32.totalorder %s1332_s1, %s826_s28  ;;  %p833_p7 = scmp.lt.u32.totalorder %s826_s28, %s1332_s1 }
  0x11   : > { %p1068_p12 = pnand %p747_p10, %p1335_p1 }
  0x13   : > { %p828_p0 = pneg %p1068_p12 }
  0x15   : > { %p829_p3 = pnand %p828_p0, %p827_p13 }
  0x17   : > { %p830_p5 = pneg %p829_p3 }
  0x19   : > { %p835_p10 = pnand %p833_p7, %p830_p5 }
  0x1b   : > { %838 = shalt.err (!%p835_p10)
}
  0x1c   : > { %s839_s6 = scalar_lea.vmem %s1061_s22, 1024  ;;  %p847_p2 = scmp.lt.s32.totalorder %s1061_s22, %s1061_s22 }
  0x1d   : > { %p840_p11 = scmp.ne.s32.totalorder %s1061_s22, %s839_s6  ;;  %p848_p13 = scmp.lt.s32.totalorder %s839_s6, %s839_s6 }
  0x1f   : > { %p842_p8 = pnand %p840_p11, %p828_p0  ;;  %p849_p3 = por %p848_p13, %p847_p2 }
  0x21   : > { %p843_p1 = pneg %p842_p8 }
  0x23   : > { %p850_p6 = pnand %p849_p3, %p843_p1 }
  0x25   : > { %853 = shalt.err (!%p850_p6)
}
  0x26   : > { %s986_s7 = smov 64   ;;  %s987_s8 = smov 4  }
  0x27   : > { %750 = dma.hbm_to_vmem [thread:$0]  (!%p1068_p12), %s1332_s1, 1024, %s1061_s22, [#allocation7], %s986_s7, %s986_s7, %s987_s8  }
  0x28   : > { %s854_s21 = scalar_lea.hbm %s1333_s2, 128 }
  0x29   : > { %p855_p2 = scmp.ne.s32.totalorder %s1333_s2, %s854_s21  ;;  %p861_p8 = scmp.lt.u32.totalorder %s854_s21, %s1333_s2 }
  0x2b   : > { %p857_p1 = pnand %p855_p2, %p828_p0 }
  0x2d   : > { %p858_p6 = pneg %p857_p1 }
  0x2f   : > { %p863_p11 = pnand %p861_p8, %p858_p6 }
  0x31   : > { %866 = shalt.err (!%p863_p11)
}
  0x32   : > { %s867_s22 = scalar_lea.vmem %s1072_s25, 128  ;;  %p875_p13 = scmp.lt.s32.totalorder %s1072_s25, %s1072_s25 }
  0x33   : > { %p868_p5 = scmp.ne.s32.totalorder %s1072_s25, %s867_s22  ;;  %p876_p3 = scmp.lt.s32.totalorder %s867_s22, %s867_s22 }
  0x35   : > { %p870_p7 = pnand %p868_p5, %p828_p0  ;;  %p877_p2 = por %p876_p3, %p875_p13 }
  0x37   : > { %p871_p10 = pneg %p870_p7 }
  0x39   : > { %p878_p1 = pnand %p877_p2, %p871_p10 }
  0x3b   : > { %881 = shalt.err (!%p878_p1)
}
  0x3c   : > { %753 = dma.hbm_to_vmem [thread:$0]  (!%p1068_p12), %s1333_s2, 128, %s1072_s25, [#allocation7]  }
  0x3d   : > { %s1127_s4 = sadd.s32 1, %s982_s15   ;;  %s27_s23 = sadd.s32 1, %s978_s14 }
  0x3e   : > { %s24_s5 = ssub.s32 %s982_s15, %s1127_s4  ;;  %p34_p0 = scmp.ne.s32.totalorder %s978_s14, %s974_s13 }
  0x3f   : > { %p25_p6 = scmp.eq.s32.totalorder %s24_s5, 0  ;;  %p35_p8 = scmp.eq.s32.totalorder %s982_s15, 0 }
  0x40   : > { %p1342_p11 = scmp.eq.s32.totalorder %s1037_s16, 1  ;;  %p764_p7 = scmp.lt.s32.totalorder %s982_s15, 2 }
  0x41   : > { %s1143_s7 = scalar_select %p25_p6, %s978_s14, %s27_s23  }
  0x42   : > { %p1137_p5 = por %p1342_p11, %p34_p0  ;;  %p36_p10 = por %p35_p8, %p34_p0 }
  0x43   : > { %s156_s8 = sand.u32 1, %s978_s14   ;;  %s617_s25 = sshll.u32 %s982_s15, 9 }
  0x44   : > { %s1343_s6 = scalar_select %p1137_p5, 1, 0 }
  0x45   : > { %s589_s9 = sshll.u32 %s156_s8, 5  ;;  %s1150_s17 = scalar_lea.hbm %s1331_s0, %s617_s25 }
  0x46   : > { %s160_s21 = scalar_lea.vmem [#allocation3], %s589_s9  ;;  %p1154_p12 = pnand %p764_p7, %p36_p10 }
  0x47   : > { %s167_s24 = sshll.u32 %s160_s21, 4  ;;  %s1158_s27 = scalar_lea.sflag [#allocation4], %s156_s8  ;;  %s1152_s24 = int_to_ptr.vmem [resolvable:$true] %s167_s24 }
  0x48   : > { %s882_s28 = scalar_lea.hbm %s1150_s17, 512  ;;  %p884_p3 = pneg %p1154_p12 }
  0x49   : > { %p883_p13 = scmp.ne.s32.totalorder %s1150_s17, %s882_s28  ;;  %s887_s30 = scalar_lea.hbm %s1331_s0, 1024 }
  0x4a   : > { %p888_p0 = scmp.lt.u32.totalorder %s1150_s17, %s1331_s0  ;;  %p889_p6 = scmp.lt.u32.totalorder %s887_s30, %s882_s28 }
  0x4b   : > { %p885_p2 = pnand %p884_p3, %p883_p13  ;;  %p891_p11 = scmp.lt.u32.totalorder %s882_s28, %s1150_s17 }
  0x4c   : > { %p890_p8 = por %p889_p6, %p888_p0 }
  0x4d   : > { %p886_p1 = pneg %p885_p2 }
  0x4e   : > { %p892_p7 = por %p891_p11, %p890_p8 }
  0x50   : > { %p893_p10 = pnand %p892_p7, %p886_p1 }
  0x52   : > { %896 = shalt.err (!%p893_p10)
}
  0x53   : > { %s897_s8 = scalar_lea.vmem %s1152_s24, 512  ;;  %s988_s9 = smov [#allocation3]  }
  0x54   : > { %p898_p13 = scmp.ne.s32.totalorder %s1152_s24, %s897_s8  ;;  %s902_s25 = sshll.u32 %s988_s9, 4  ;;  %s903_s25 = int_to_ptr.vmem [resolvable:$false] %s902_s25 }
  0x55   : > { %s904_s10 = scalar_lea.vmem %s903_s25, 1024  ;;  %p905_p4 = scmp.lt.s32.totalorder %s1152_s24, %s903_s25 }
  0x56   : > { %p900_p2 = pnand %p898_p13, %p884_p3  ;;  %p906_p0 = scmp.lt.s32.totalorder %s904_s10, %s897_s8 }
  0x58   : > { %p901_p5 = pneg %p900_p2  ;;  %p907_p6 = por %p906_p0, %p905_p4 }
  0x5a   : > { %p908_p8 = pnand %p907_p6, %p901_p5 }
  0x5c   : > { %911 = shalt.err (!%p908_p8)
}
  0x5d   : > { %s989_s11 = smov 128   ;;  %s990_s21 = smov 8  }
  0x5e   : > { %757 = dma.hbm_to_vmem [thread:$0]  (!%p1154_p12), %s1150_s17, 512, %s1152_s24, %s1158_s27, %s989_s11, %s989_s11, %s990_s21  }
  0x5f   : > { %179 = sbr.rel (%p1057_p9) target bundleno = 1071 (0x42f), region = 32  ;;  %s1189_s28 = sand.u32 (!%p1057_p9), 1, %s974_s13  }
  0x60   : > { %s593_s22 = sshll.u32 (!%p1057_p9), %s1189_s28, 5  ;;  %s182_s29 = scalar_lea.sflag (!%p1057_p9), [#allocation4], %s1189_s28 }
  0x61   : > { %s1193_s30 = scalar_lea.vmem (!%p1057_p9), [#allocation3], %s593_s22  ;;  %p1345_p4 = scmp.ne.s32.totalorder (!%p1057_p9), %s1338_s18, 0 }
  0x66   : > { %957 = dma.done.wait (%p1345_p4), %s182_s29, 512  }
  0x67   : > { %959 = vsyncadd (%p1345_p4), %s182_s29, 4294966784  ;;  %p1346_p5 = scmp.eq.s32.totalorder %s1037_s16, 0 }
  0x69   : > { %961 = dma.done.wait (%p1346_p5), [#allocation7], 1152   ;;  %p1347_p9 = pmov %p1346_p5 }
  0x6a   : > { %s596_s20 = sshll.u32 %s1189_s28, 4  ;;  %p1348_p12 = scmp.ne.s32.totalorder %s1037_s16, 0 }
  0x6b   : > { %963 = vsyncadd (%p1347_p9), [#allocation7], 4294966144  ;;  %s1204_s17 = scalar_lea.vmem [#allocation9], %s596_s20  ;;  %v223_v0 = vld [vmem:[#allocation8] sm:$0xff] (!%p1348_p12) }
  0x6c   : > { %222 = sbr.rel (%p1348_p12) target bundleno = 115 (0x73), region = 48  ;;  %224 = vst [vmem:[#allocation2] sm:$0xff] (!%p1348_p12), %v223_v0 }
  0x73 PF: > { %v1208_v1 = vld [vmem:[#allocation6] sm:$0xff]   ;;  %v991_v2 = vmov 0.0   ;;  %v1213_v3 = vld [vmem:[#allocation6 + $0x8] sm:$0xff]   ;;  %vm992_vm0 = vmmov 0   ;;  %v1223_v4 = vld [vmem:[#allocation6 + $0x10] sm:$0xff]   ;;  %s618_s18 = sshll.u32 %s1037_s16, 8 }
  0x74   : > { %655 = vmatprep.subr.bf16.mxu0 %v991_v2  ;;  %675 = vmatprep.subr.bf16.mxu1 %v991_v2  ;;  %v1229_v5 = vld [vmem:[#allocation6 + $0x18] sm:$0xff]   ;;  %v814_v6 = vld [vmem:[#allocation6 + $0x20] sm:$0xff]   ;;  %v815_v7 = vld [vmem:[#allocation6 + $0x28] sm:$0xff]   ;;  %s492_s24 = sshll.u32 %s1204_s17, 4  ;;  %s1284_s23 = scalar_lea.hbm %s1334_s3, %s618_s18  ;;  %s1286_s24 = int_to_ptr.vmem [resolvable:$true] %s492_s24 }
  0x75   : > { %656 = vmatpush3.bf16.msra.mxu0 %v1208_v1  ;;  %671 = vmatprep.mubr.msk.bf16.mxu0 %vm992_vm0, %v991_v2  ;;  %v816_v8 = vld [vmem:[#allocation6 + $0x30] sm:$0xff]   ;;  %v817_v9 = vld [vmem:[#allocation6 + $0x38] sm:$0xff]   ;;  %v242_v12 = vld [vmem:[%s1193_s30] sm:$0xff]  ;;  %s479_s5 = scalar_lea.sflag [#allocation5], %s1189_s28  ;;  %s912_s8 = scalar_lea.vmem %s1286_s24, 256 }
  0x76   : > { %657 = vmatprep.subr.bf16.mxu0 %v991_v2  ;;  %676 = vmatpush3.bf16.msra.mxu1 %v1208_v1  ;;  %v241_v10 = vld [vmem:[#allocation2] sm:$0xff]  ;;  %v606_v20 = vld [vmem:[%s1193_s30 + $0x8] sm:$0xff]  ;;  %v608_v28 = vld [vmem:[%s1193_s30 + $0x10] sm:$0xff]  ;;  %p913_p3 = scmp.ne.s32.totalorder %s1286_s24, %s912_s8  ;;  %p1349_p1 = scmp.ne.s32.totalorder %s1343_s6, 0 }
  0x77   : > { %677 = vmatprep.subr.bf16.mxu1 %v991_v2  ;;  %691 = vmatprep.mubr.msk.bf16.mxu1 %vm992_vm0, %v991_v2  ;;  %v243_v11 = vpack.c.bf16 %v241_v10, %v241_v10  ;;  %v610_v36 = vld [vmem:[%s1193_s30 + $0x18] sm:$0xff]  ;;  %s993_s16 = smov [#allocation9]  }
  0x78   : > { %p914_p11 = pnand %p913_p3, %p1349_p1  ;;  %s916_s9 = sshll.u32 %s993_s16, 4  ;;  %s917_s9 = int_to_ptr.vmem [resolvable:$false] %s916_s9 }
  0x79   : > { %658 = vmatpush3.bf16.msra.mxu0 %v1213_v3  ;;  %s918_s25 = scalar_lea.vmem %s917_s9, 512  ;;  %p919_p10 = scmp.lt.s32.totalorder %s1286_s24, %s917_s9 }
  0x7a   : > { %659 = vmatprep.subr.bf16.mxu0 %v991_v2  ;;  %678 = vmatpush3.bf16.msra.mxu1 %v1213_v3  ;;  %p915_p7 = pneg %p914_p11  ;;  %p920_p13 = scmp.lt.s32.totalorder %s918_s25, %s912_s8 }
  0x7b   : > { %679 = vmatprep.subr.bf16.mxu1 %v991_v2 }
  0x7c   : > { %p921_p2 = por %p920_p13, %p919_p10 }
  0x7d   : > { %660 = vmatpush3.bf16.msra.mxu0 %v1223_v4 }
  0x7e   : > { %661 = vmatprep.subr.bf16.mxu0 %v991_v2  ;;  %680 = vmatpush3.bf16.msra.mxu1 %v1223_v4  ;;  %p922_p0 = pnand %p921_p2, %p915_p7 }
  0x7f   : > { %681 = vmatprep.subr.bf16.mxu1 %v991_v2 }
  0x81   : > { %662 = vmatpush3.bf16.msra.mxu0 %v1229_v5 }
  0x82   : > { %663 = vmatprep.subr.bf16.mxu0 %v991_v2  ;;  %682 = vmatpush3.bf16.msra.mxu1 %v1229_v5 }
  0x83   : > { %683 = vmatprep.subr.bf16.mxu1 %v991_v2 }
  0x85   : > { %664 = vmatpush3.bf16.msra.mxu0 %v814_v6 }
  0x86   : > { %665 = vmatprep.subr.bf16.mxu0 %v991_v2  ;;  %684 = vmatpush3.bf16.msra.mxu1 %v814_v6 }
  0x87   : > { %685 = vmatprep.subr.bf16.mxu1 %v991_v2 }
  0x89   : > { %666 = vmatpush3.bf16.msra.mxu0 %v815_v7 }
  0x8a   : > { %667 = vmatprep.subr.bf16.mxu0 %v991_v2  ;;  %686 = vmatpush3.bf16.msra.mxu1 %v815_v7 }
  0x8b   : > { %687 = vmatprep.subr.bf16.mxu1 %v991_v2 }
  0x8d   : > { %668 = vmatpush3.bf16.msra.mxu0 %v816_v8 }
  0x8e   : > { %669 = vmatprep.subr.bf16.mxu0 %v991_v2  ;;  %688 = vmatpush3.bf16.msra.mxu1 %v816_v8 }
  0x8f   : > { %689 = vmatprep.subr.bf16.mxu1 %v991_v2 }
  0x91   : > { %670 = vmatpush3.bf16.msra.mxu0 %v817_v9 }
  0x92   : > { %690 = vmatpush3.bf16.msra.mxu1 %v817_v9  ;;  %695 = vmatprep.subr.bf16.mxu0 %v991_v2 }
  0x93   : > { %715 = vmatprep.subr.bf16.mxu1 %v991_v2 }
  0x94   : > { %672 = vmatmul.mubr.bf16.vlgmr.msra.gmra.mrb[0].mxu0 %v243_v11 }
  0x95   : > { %696 = vmatpush3.bf16.msra.mxu0 %v1208_v1  ;;  %711 = vmatprep.mubr.msk.bf16.mxu0 %vm992_vm0, %v991_v2 }
  0x96   : > { %697 = vmatprep.subr.bf16.mxu0 %v991_v2 }
  0x99   : > { %698 = vmatpush3.bf16.msra.mxu0 %v1213_v3 }
  0x9a   : > { %699 = vmatprep.subr.bf16.mxu0 %v991_v2 }
  0x9d   : > { %700 = vmatpush3.bf16.msra.mxu0 %v1223_v4 }
  0x9e   : > { %701 = vmatprep.subr.bf16.mxu0 %v991_v2 }
  0xa1   : > { %702 = vmatpush3.bf16.msra.mxu0 %v1229_v5 }
  0xa2   : > { %703 = vmatprep.subr.bf16.mxu0 %v991_v2 }
  0xa5   : > { %704 = vmatpush3.bf16.msra.mxu0 %v814_v6 }
  0xa6   : > { %705 = vmatprep.subr.bf16.mxu0 %v991_v2 }
  0xa9   : > { %706 = vmatpush3.bf16.msra.mxu0 %v815_v7 }
  0xaa   : > { %707 = vmatprep.subr.bf16.mxu0 %v991_v2 }
  0xad   : > { %708 = vmatpush3.bf16.msra.mxu0 %v816_v8 }
  0xae   : > { %709 = vmatprep.subr.bf16.mxu0 %v991_v2 }
  0xb1   : > { %710 = vmatpush3.bf16.msra.mxu0 %v817_v9 }
 0x167   : > { %v326_v13 = vpop.f32.mrb[0].mxu0 }
 0x168   : > { %v332_v14 = vadd.f32 %v326_v13, %v242_v12  ;;  %v673_v15 = vpop.f32.mrb[1].mxu0 }
 0x169   : > { %v329_v16 = vpop.f32.mrb[2].mxu0 }
 0x16a   : > { %818 = vtanh.f32 %v332_v14  ;;  %v674_v17 = vpop.f32.mrb[3].mxu0 }
 0x174   : > { %v819_v18 = vpop.eup %818 }
 0x175   : > { %v334_v19 = vpack.c.bf16 %v819_v18, %v819_v18 }
 0x177   : > { %335 = vst [vmem:[%s1204_s17] sm:$0xf] %v334_v19  ;;  %692 = vmatmul.mubr.bf16.vlgmr.msra.gmra.mrb[0].mxu1 %v334_v19 }
 0x178   : > { %716 = vmatpush3.bf16.msra.mxu1 %v1208_v1  ;;  %731 = vmatprep.mubr.msk.bf16.mxu1 %vm992_vm0, %v991_v2 }
 0x179   : > { %717 = vmatprep.subr.bf16.mxu1 %v991_v2 }
 0x17c   : > { %718 = vmatpush3.bf16.msra.mxu1 %v1213_v3 }
 0x17d   : > { %719 = vmatprep.subr.bf16.mxu1 %v991_v2 }
 0x180   : > { %720 = vmatpush3.bf16.msra.mxu1 %v1223_v4 }
 0x181   : > { %721 = vmatprep.subr.bf16.mxu1 %v991_v2 }
 0x184   : > { %722 = vmatpush3.bf16.msra.mxu1 %v1229_v5 }
 0x185   : > { %723 = vmatprep.subr.bf16.mxu1 %v991_v2 }
 0x188   : > { %724 = vmatpush3.bf16.msra.mxu1 %v814_v6 }
 0x189   : > { %725 = vmatprep.subr.bf16.mxu1 %v991_v2 }
 0x18c   : > { %726 = vmatpush3.bf16.msra.mxu1 %v815_v7 }
 0x18d   : > { %727 = vmatprep.subr.bf16.mxu1 %v991_v2 }
 0x190   : > { %728 = vmatpush3.bf16.msra.mxu1 %v816_v8 }
 0x191   : > { %729 = vmatprep.subr.bf16.mxu1 %v991_v2 }
 0x194   : > { %730 = vmatpush3.bf16.msra.mxu1 %v817_v9 }
 0x24a   : > { %v372_v21 = vpop.f32.mrb[0].mxu1 }
 0x24b   : > { %v378_v22 = vadd.f32 %v606_v20, %v372_v21  ;;  %v693_v23 = vpop.f32.mrb[1].mxu1 }
 0x24c   : > { %v375_v24 = vpop.f32.mrb[2].mxu1 }
 0x24d   : > { %820 = vtanh.f32 %v378_v22  ;;  %v694_v25 = vpop.f32.mrb[3].mxu1 }
 0x257   : > { %v821_v26 = vpop.eup %820 }
 0x258   : > { %v380_v27 = vpack.c.bf16 %v821_v26, %v821_v26 }
 0x25a   : > { %607 = vst [vmem:[%s1204_s17 + $0x4] sm:$0xf] %v380_v27  ;;  %712 = vmatmul.mubr.bf16.vlgmr.msra.gmra.mrb[4].mxu0 %v380_v27 }
 0x32d   : > { %v419_v29 = vpop.f32.mrb[4].mxu0 }
 0x32e   : > { %v425_v30 = vadd.f32 %v608_v28, %v419_v29  ;;  %v713_v31 = vpop.f32.mrb[5].mxu0 }
 0x32f   : > { %v422_v32 = vpop.f32.mrb[6].mxu0 }
 0x330   : > { %822 = vtanh.f32 %v425_v30  ;;  %v714_v33 = vpop.f32.mrb[7].mxu0 }
 0x33a   : > { %v823_v34 = vpop.eup %822 }
 0x33b   : > { %v427_v35 = vpack.c.bf16 %v823_v34, %v823_v34 }
 0x33d   : > { %609 = vst [vmem:[%s1204_s17 + $0x8] sm:$0xf] %v427_v35  ;;  %732 = vmatmul.mubr.bf16.vlgmr.msra.gmra.mrb[4].mxu1 %v427_v35 }
 0x410   : > { %v466_v37 = vpop.f32.mrb[4].mxu1 }
 0x411   : > { %v472_v38 = vadd.f32 %v610_v36, %v466_v37  ;;  %v733_v39 = vpop.f32.mrb[5].mxu1 }
 0x412   : > { %v469_v40 = vpop.f32.mrb[6].mxu1 }
 0x413   : > { %824 = vtanh.f32 %v472_v38  ;;  %v734_v41 = vpop.f32.mrb[7].mxu1 }
 0x41d   : > { %v825_v42 = vpop.eup %824 }
 0x41e   : > { %v474_v43 = vpack.c.bf16 %v825_v42, %v825_v42  ;;  %477 = vst [vmem:[#allocation2] sm:$0xff] %v825_v42 }
 0x420   : > { %611 = vst [vmem:[%s1204_s17 + $0xc] sm:$0xf] %v474_v43 }
 0x421   : > { %925 = shalt.err (!%p922_p0)
}
 0x422   : > { %s926_s10 = scalar_lea.hbm %s1284_s23, 256  ;;  %s930_s22 = scalar_lea.hbm %s1334_s3, 512 }
 0x423   : > { %p927_p6 = scmp.ne.s32.totalorder %s1284_s23, %s926_s10  ;;  %p931_p5 = scmp.lt.u32.totalorder %s1284_s23, %s1334_s3 }
 0x424   : > { %p932_p9 = scmp.lt.u32.totalorder %s930_s22, %s926_s10  ;;  %p934_p3 = scmp.lt.u32.totalorder %s926_s10, %s1284_s23 }
 0x425   : > { %p928_p8 = pnand %p927_p6, %p1349_p1 }
 0x426   : > { %p933_p12 = por %p932_p9, %p931_p5 }
 0x427   : > { %p929_p4 = pneg %p928_p8 }
 0x428   : > { %p935_p11 = por %p934_p3, %p933_p12 }
 0x42a   : > { %p936_p7 = pnand %p935_p11, %p929_p4 }
 0x42c   : > { %939 = shalt.err (!%p936_p7)
}
 0x42d   : > { %s994_s20 = smov 64   ;;  %s995_s17 = smov 4  }
 0x42e   : > { %745 = dma.vmem_to_hbm [thread:$0]  (%p1349_p1), %s1286_s24, 256, %s1284_s23, %s479_s5, %s994_s20, %s994_s20, %s995_s17  }
 0x42f PF: > { %s507_s18 = sand.u32 1, %s970_s12   ;;  %p1350_p10 = scmp.ne.s32.totalorder %s1339_s19, 0 }
 0x430   : > { %p1351_p13 = scmp.ge.s32.totalorder %s982_s15, 2  ;;  %s508_s26 = scalar_lea.sflag [#allocation5], %s507_s18 }
 0x432   : > { %p759_p2 = pnand %p1351_p13, %p1350_p10 }
 0x434   : > { %965 = dma.done.wait (!%p759_p2), %s508_s26, 256  }
 0x435   : > { %967 = vsyncadd (!%p759_p2), %s508_s26, 4294967040  ;;  %p17_p0 = scmp.ge.s32.totalorder %s1127_s4, 4   ;;  %s1352_s12 = smov %s974_s13 }
 0x436   : > { %s1353_s13 = smov %s978_s14  ;;  %s1354_s14 = smov %s1143_s7 }
 0x437   : > { %s1355_s15 = smov %s1127_s4  ;;  %19 = sbr.rel (!%p17_p0) target bundleno = 6 (0x6), region = 95 }
 0x43e   :  { %513 = vsyncpa [#allocation4], 1 }
 0x43f   :  { %515 = vsyncpa [#allocation4 + $0x1], 1 }
 0x440   :  { %516 = vsyncpa [#allocation7], 1 }
 0x441   :  { %517 = vsyncpa [#allocation5], 1 }
 0x442   :  { %519 = vsyncpa [#allocation5 + $0x1], 1 }

</bundles_post_ra>
